<compile_context>
chip_gen: v6e
topology: v6e:2x2x1
jax: 0.10.0
libtpu: 0.0.40
codegen_flags: <defaults>
</compile_context>

<pallas_src>
import jax
import jax.numpy as jnp
import numpy as np
from jax.experimental import pallas as pl
from jax.experimental.pallas import tpu as pltpu

EPS = 1e-5  # PyTorch BatchNorm1d default eps


def make_up_kernel(N, L, Cin, Cout, K, residual):
    pad = K // 2
    P = N * L
    inv_P = 1.0 / float(P)

    def _bn(h, gamma, beta):
        # Training-mode BatchNorm1d in (C, P) layout: per-channel stats over the
        # P = N*L lane axis, biased variance, single pass (sum + sum of squares).
        s1 = jnp.sum(h, axis=1, keepdims=True)
        s2 = jnp.sum(h * h, axis=1, keepdims=True)
        mean = s1 * inv_P
        var = s2 * inv_P - mean * mean
        scale = jax.lax.rsqrt(var + EPS) * gamma
        return (h - mean) * scale + beta

    def _shifted(h, d):
        # v[c, p] = h[c, p + d] when position (p % L) + d stays inside the same
        # batch row, else 0  (implements 'same' zero padding in the flattened
        # (C, N*L) layout without any per-batch copies).
        C = h.shape[0]
        if d == 0:
            return h
        if d > 0:
            v = jnp.concatenate([h[:, d:], jnp.zeros((C, d), h.dtype)], axis=1)
        else:
            v = jnp.concatenate([jnp.zeros((C, -d), h.dtype), h[:, :P + d]], axis=1)
        lpos = jax.lax.broadcasted_iota(jnp.int32, (C, P), 1) % L
        valid = jnp.logical_and(lpos + d >= 0, lpos + d < L)
        return jnp.where(valid, v, 0.0)

    def _conv_same(h, w):
        # h: (C, P) f32, w: (Cout, K*C) bf16  ->  (Cout, P) f32
        # One MXU matmul over the tap-stacked input (contraction dim = K*C).
        stack = jnp.concatenate([_shifted(h, t - pad) for t in range(K)], axis=0)
        return jnp.dot(w, stack.astype(jnp.bfloat16),
                       preferred_element_type=jnp.float32)

    def kernel(x1_ref, x2_ref, g0_ref, b0_ref, w1_ref, w2_ref, g1_ref, b1_ref, *rest):
        if residual and Cin != Cout:
            rw_ref, rb_ref, o_ref = rest
        else:
            (o_ref,) = rest

        # Fused channel concat (sublane axis) of upsampled x1 and skip x2.
        x = jnp.concatenate([x1_ref[...], x2_ref[...]], axis=0)      # (Cin, P)

        # Up.batch_norm = BatchNorm1d(in_channel)
        y = _bn(x, g0_ref[...], b0_ref[...])

        # DoubleConv
        if residual:
            if Cin != Cout:
                x_s = jnp.dot(rw_ref[...], y.astype(jnp.bfloat16),
                              preferred_element_type=jnp.float32) + rb_ref[...]
            else:
                x_s = y

        h = _conv_same(y, w1_ref[...])                 # conv1 (no bias)
        h = _bn(h, g1_ref[...], b1_ref[...])           # bn1
        h = jnp.maximum(h, 0.0)                        # relu
        h = _conv_same(h, w2_ref[...])                 # conv2 (no bias)
        h = _bn(h, g1_ref[...], b1_ref[...])           # bn1 again (as in reference)
        if residual:
            h = h + x_s
        o_ref[...] = jnp.maximum(h, 0.0)               # relu, lane-dense store

    return kernel


def up_forward(x1, x2, params, *, residual=False, no_up=False):
    """x1: (N, C1, L1), x2: (N, C2, L) in PyTorch NCL layout. Returns (N, Cout, L)."""
    if not no_up:
        x1 = jnp.repeat(x1, 2, axis=2)            # nn.Upsample(scale_factor=2, 'nearest')
    N, C1, L = x1.shape
    N2, C2, L2 = x2.shape
    assert (N2, L2) == (N, L)
    Cin = C1 + C2
    Cout, _, K = params["conv1_w"].shape
    P = N * L

    # NCL -> channel-major (C, N*L): one transpose per input, concat fused in-kernel.
    def to_cm(a):
        return jnp.transpose(a, (1, 0, 2)).reshape(a.shape[1], P).astype(jnp.float32)

    x1f = to_cm(x1)
    x2f = to_cm(x2)

    # Conv weights in tap-stacked layout: row co, col t*C + ci  == w[co, ci, t].
    w1 = jnp.transpose(params["conv1_w"], (0, 2, 1)).reshape(Cout, K * Cin).astype(jnp.bfloat16)
    w2 = jnp.transpose(params["conv2_w"], (0, 2, 1)).reshape(Cout, K * Cout).astype(jnp.bfloat16)
    g0 = params["bn0_g"].reshape(Cin, 1).astype(jnp.float32)
    b0 = params["bn0_b"].reshape(Cin, 1).astype(jnp.float32)
    g1 = params["bn1_g"].reshape(Cout, 1).astype(jnp.float32)
    b1 = params["bn1_b"].reshape(Cout, 1).astype(jnp.float32)

    args = [x1f, x2f, g0, b0, w1, w2, g1, b1]
    if residual and Cin != Cout:
        args += [params["res_w"][:, :, 0].astype(jnp.bfloat16),       # (Cout, Cin)
                 params["res_b"].reshape(Cout, 1).astype(jnp.float32)]

    # Advisory cost + explicit scoped-VMEM limit (tiny working set; fits all gens).
    flops = 2 * P * K * Cout * (Cin + Cout) + 10 * P * (Cin + 2 * Cout)
    if residual and Cin != Cout:
        flops += 2 * P * Cin * Cout
    bytes_accessed = 4 * P * (Cin + Cout) + 2 * K * Cout * (Cin + Cout) + 8 * (Cin + Cout)
    vmem_est = 4 * P * ((K + 3) * Cin + (K + 6) * Cout)
    vmem_limit = int(min(64 * 1024 * 1024, max(8 * 1024 * 1024, 8 * vmem_est)))

    kernel = make_up_kernel(N, L, Cin, Cout, K, residual)
    out_cm = pl.pallas_call(
        kernel,
        out_shape=jax.ShapeDtypeStruct((Cout, P), jnp.float32),
        in_specs=[pl.BlockSpec(memory_space=pltpu.MemorySpace.VMEM)] * len(args),
        out_specs=pl.BlockSpec(memory_space=pltpu.MemorySpace.VMEM),
        compiler_params=pltpu.CompilerParams(vmem_limit_bytes=vmem_limit),
        cost_estimate=pl.CostEstimate(flops=int(flops),
                                      transcendentals=int(Cin + 2 * Cout),
                                      bytes_accessed=int(bytes_accessed)),
    )(*args)
    # (Cout, N*L) -> (N, Cout, L): one transpose for the output.
    return jnp.transpose(out_cm.reshape(Cout, N, L), (1, 0, 2))


def up_forward_ref(x1, x2, params, *, residual=False, no_up=False,
                   matmul_dtype=jnp.float32):
    """Pure-JAX reference (XLA convs / BN). matmul_dtype=bfloat16 mirrors the
    kernel's bf16 MXU operands (f32 accumulation); BN always in f32."""
    if not no_up:
        x1 = jnp.repeat(x1, 2, axis=2)
    x = jnp.concatenate([x1, x2], axis=1).astype(jnp.float32)
    Cin = x.shape[1]
    Cout, _, K = params["conv1_w"].shape
    pad = K // 2

    def bn(h, g, b):
        mean = jnp.mean(h, axis=(0, 2), keepdims=True)
        var = jnp.mean((h - mean) ** 2, axis=(0, 2), keepdims=True)
        return (h - mean) * jax.lax.rsqrt(var + EPS) * g[None, :, None] + b[None, :, None]

    def conv(h, w, p):
        return jax.lax.conv_general_dilated(
            h.astype(matmul_dtype), w.astype(matmul_dtype),
            window_strides=(1,), padding=[(p, p)],
            dimension_numbers=("NCH", "OIH", "NCH"),
            preferred_element_type=jnp.float32)

    y = bn(x, params["bn0_g"], params["bn0_b"])
    if residual:
        x_s = y
        if Cin != Cout:
            x_s = conv(y, params["res_w"], 0) + params["res_b"][None, :, None]
    h = conv(y, params["conv1_w"], pad)
    h = bn(h, params["bn1_g"], params["bn1_b"])
    h = jax.nn.relu(h)
    h = conv(h, params["conv2_w"], pad)
    h = bn(h, params["bn1_g"], params["bn1_b"])
    if residual:
        h = h + x_s
    return jax.nn.relu(h)


def init_up_params(key, in_channel, out_channel, kernel_size, residual=False):
    ks = jax.random.split(key, 8)
    p = {
        "conv1_w": 0.2 * jax.random.normal(ks[0], (out_channel, in_channel, kernel_size), jnp.float32),
        "conv2_w": 0.2 * jax.random.normal(ks[1], (out_channel, out_channel, kernel_size), jnp.float32),
        "bn0_g": 1.0 + 0.1 * jax.random.normal(ks[2], (in_channel,), jnp.float32),
        "bn0_b": 0.1 * jax.random.normal(ks[3], (in_channel,), jnp.float32),
        "bn1_g": 1.0 + 0.1 * jax.random.normal(ks[4], (out_channel,), jnp.float32),
        "bn1_b": 0.1 * jax.random.normal(ks[5], (out_channel,), jnp.float32),
    }
    if residual and in_channel != out_channel:
        p["res_w"] = 0.2 * jax.random.normal(ks[6], (out_channel, in_channel, 1), jnp.float32)
        p["res_b"] = 0.1 * jax.random.normal(ks[7], (out_channel,), jnp.float32)
    return p


if __name__ == "__main__":
    # x1 is the deep feature (upsampled x2 along length), x2 is the skip connection.
    # L1=64 -> L=128, so P = N*L = 256 is lane-dense (multiple of 128).
    N, C1, C2, L1, K = 2, 8, 8, 64, 3
    in_channel = C1 + C2   # channels after upsample + concat = 16
    # TODO(synk): nn.Dropout1d and bn2 are constructed in DoubleConv but never
    # applied in the reference forward; omitted on purpose.

    key = jax.random.PRNGKey(0)
    for (out_channel, residual) in [(8, False),   # Up defaults
                                    (8, True),    # residual with 1x1 res_conv (Cin != Cout)
                                    (16, True)]:  # residual identity path (Cin == Cout)
        key, k1, k2, kp = jax.random.split(key, 4)
        x1 = jax.random.normal(k1, (N, C1, L1), jnp.float32)          # PyTorch NCL
        x2 = jax.random.normal(k2, (N, C2, 2 * L1), jnp.float32)
        params = init_up_params(kp, in_channel, out_channel, K, residual)

        out = jax.block_until_ready(up_forward(x1, x2, params, residual=residual))
        assert out.shape == (N, out_channel, 2 * L1), out.shape

        # Tight check vs a reference whose conv operands are also bf16 (same rounding).
        ref_bf16 = up_forward_ref(x1, x2, params, residual=residual,
                                  matmul_dtype=jnp.bfloat16)
        np.testing.assert_allclose(np.asarray(out), np.asarray(ref_bf16),
                                   rtol=1e-2, atol=1e-2)
        # Looser sanity check vs the pure-f32 reference (bf16 MXU quantization only).
        ref_f32 = up_forward_ref(x1, x2, params, residual=residual,
                                 matmul_dtype=jnp.float32)
        np.testing.assert_allclose(np.asarray(out), np.asarray(ref_f32),
                                   rtol=6e-2, atol=6e-2)

    print("KERNEL_OK")
</pallas_src>

<mosaic_0001>
module attributes {stable_mosaic.version = 11 : i64} {
  func.func @kernel(%arg0: memref<8x256xf32, #tpu.memory_space<vmem>>, %arg1: memref<8x256xf32, #tpu.memory_space<vmem>>, %arg2: memref<16x1xf32, #tpu.memory_space<vmem>>, %arg3: memref<16x1xf32, #tpu.memory_space<vmem>>, %arg4: memref<8x48xbf16, #tpu.memory_space<vmem>>, %arg5: memref<8x24xbf16, #tpu.memory_space<vmem>>, %arg6: memref<8x1xf32, #tpu.memory_space<vmem>>, %arg7: memref<8x1xf32, #tpu.memory_space<vmem>>, %arg8: memref<8x256xf32, #tpu.memory_space<vmem>>) attributes {dimension_semantics = [], scalar_prefetch = 0 : i64, scratch_operands = 0 : i64, tpu.core_type = #tpu.core_type<tc>} {
    %c0 = arith.constant 0 : index
    %c0_0 = arith.constant 0 : index
    %0 = vector.load %arg0[%c0, %c0_0] : memref<8x256xf32, #tpu.memory_space<vmem>>, vector<8x256xf32>
    %c0_1 = arith.constant 0 : index
    %c0_2 = arith.constant 0 : index
    %1 = vector.load %arg1[%c0_1, %c0_2] : memref<8x256xf32, #tpu.memory_space<vmem>>, vector<8x256xf32>
    %2 = tpu.concatenate %0, %1 in 0 : vector<8x256xf32>, vector<8x256xf32> -> vector<16x256xf32>
    %c0_3 = arith.constant 0 : index
    %c0_4 = arith.constant 0 : index
    %3 = vector.load %arg2[%c0_3, %c0_4] : memref<16x1xf32, #tpu.memory_space<vmem>>, vector<16x1xf32>
    %c0_5 = arith.constant 0 : index
    %c0_6 = arith.constant 0 : index
    %4 = vector.load %arg3[%c0_5, %c0_6] : memref<16x1xf32, #tpu.memory_space<vmem>>, vector<16x1xf32>
    %cst = arith.constant dense<0.000000e+00> : vector<16xf32>
    %5 = vector.multi_reduction <add>, %2, %cst [1] : vector<16x256xf32> to vector<16xf32>
    %6 = vector.shape_cast %5 : vector<16xf32> to vector<16x1xf32>
    %7 = arith.mulf %2, %2 : vector<16x256xf32>
    %cst_7 = arith.constant dense<0.000000e+00> : vector<16xf32>
    %8 = vector.multi_reduction <add>, %7, %cst_7 [1] : vector<16x256xf32> to vector<16xf32>
    %9 = vector.shape_cast %8 : vector<16xf32> to vector<16x1xf32>
    %cst_8 = arith.constant 3.906250e-03 : f32
    %10 = vector.broadcast %cst_8 : f32 to vector<16x1xf32>
    %11 = arith.mulf %6, %10 : vector<16x1xf32>
    %cst_9 = arith.constant 3.906250e-03 : f32
    %12 = vector.broadcast %cst_9 : f32 to vector<16x1xf32>
    %13 = arith.mulf %9, %12 : vector<16x1xf32>
    %14 = arith.mulf %11, %11 : vector<16x1xf32>
    %15 = arith.subf %13, %14 : vector<16x1xf32>
    %cst_10 = arith.constant 9.99999974E-6 : f32
    %16 = vector.broadcast %cst_10 : f32 to vector<16x1xf32>
    %17 = arith.addf %15, %16 : vector<16x1xf32>
    %18 = math.rsqrt %17 : vector<16x1xf32>
    %19 = arith.mulf %18, %3 : vector<16x1xf32>
    %20 = vector.broadcast %11 : vector<16x1xf32> to vector<16x256xf32>
    %21 = arith.subf %2, %20 : vector<16x256xf32>
    %22 = vector.broadcast %19 : vector<16x1xf32> to vector<16x256xf32>
    %23 = arith.mulf %21, %22 : vector<16x256xf32>
    %24 = vector.broadcast %4 : vector<16x1xf32> to vector<16x256xf32>
    %25 = arith.addf %23, %24 : vector<16x256xf32>
    %c0_11 = arith.constant 0 : index
    %c0_12 = arith.constant 0 : index
    %26 = vector.load %arg4[%c0_11, %c0_12] : memref<8x48xbf16, #tpu.memory_space<vmem>>, vector<8x48xbf16>
    %cst_13 = arith.constant 0.000000e+00 : f32
    %27 = vector.broadcast %cst_13 : f32 to vector<16x1xf32>
    %28 = vector.extract_strided_slice %25 {offsets = [0, 0], sizes = [16, 255], strides = [1, 1]} : vector<16x256xf32> to vector<16x255xf32>
    %29 = tpu.concatenate %27, %28 in 1 : vector<16x1xf32>, vector<16x255xf32> -> vector<16x256xf32>
    %30 = tpu.iota {dimensions = array<i32: 1>} : vector<16x256xi32>
    %c128_i32 = arith.constant 128 : i32
    %c0_i32 = arith.constant 0 : i32
    %31 = arith.cmpi eq, %c128_i32, %c0_i32 : i32
    %c1_i32 = arith.constant 1 : i32
    %32 = arith.select %31, %c1_i32, %c128_i32 : i32
    %33 = vector.broadcast %32 : i32 to vector<16x256xi32>
    %34 = arith.remsi %30, %33 : vector<16x256xi32>
    %c0_i32_14 = arith.constant 0 : i32
    %35 = vector.broadcast %c0_i32_14 : i32 to vector<16x256xi32>
    %36 = arith.cmpi ne, %34, %35 : vector<16x256xi32>
    %c0_i32_15 = arith.constant 0 : i32
    %37 = vector.broadcast %c0_i32_15 : i32 to vector<16x256xi32>
    %38 = arith.cmpi slt, %34, %37 : vector<16x256xi32>
    %c0_i32_16 = arith.constant 0 : i32
    %39 = arith.cmpi slt, %32, %c0_i32_16 : i32
    %40 = vector.broadcast %39 : i1 to vector<16x256xi1>
    %41 = vector.broadcast %40 : vector<16x256xi1> to vector<16x256xi1>
    %42 = arith.xori %38, %41 : vector<16x256xi1>
    %43 = arith.andi %42, %36 : vector<16x256xi1>
    %44 = vector.broadcast %32 : i32 to vector<16x256xi32>
    %45 = arith.addi %34, %44 : vector<16x256xi32>
    %46 = arith.select %43, %45, %34 : vector<16x256xi1>, vector<16x256xi32>
    %c-1_i32 = arith.constant -1 : i32
    %47 = vector.broadcast %c-1_i32 : i32 to vector<16x256xi32>
    %48 = arith.addi %46, %47 : vector<16x256xi32>
    %c0_i32_17 = arith.constant 0 : i32
    %49 = vector.broadcast %c0_i32_17 : i32 to vector<16x256xi32>
    %50 = arith.cmpi sge, %48, %49 : vector<16x256xi32>
    %c-1_i32_18 = arith.constant -1 : i32
    %51 = vector.broadcast %c-1_i32_18 : i32 to vector<16x256xi32>
    %52 = arith.addi %46, %51 : vector<16x256xi32>
    %c128_i32_19 = arith.constant 128 : i32
    %53 = vector.broadcast %c128_i32_19 : i32 to vector<16x256xi32>
    %54 = arith.cmpi slt, %52, %53 : vector<16x256xi32>
    %55 = arith.andi %50, %54 : vector<16x256xi1>
    %cst_20 = arith.constant 0.000000e+00 : f32
    %56 = vector.broadcast %cst_20 : f32 to vector<16x256xf32>
    %57 = arith.select %55, %29, %56 : vector<16x256xi1>, vector<16x256xf32>
    %58 = vector.extract_strided_slice %25 {offsets = [0, 1], sizes = [16, 255], strides = [1, 1]} : vector<16x256xf32> to vector<16x255xf32>
    %cst_21 = arith.constant 0.000000e+00 : f32
    %59 = vector.broadcast %cst_21 : f32 to vector<16x1xf32>
    %60 = tpu.concatenate %58, %59 in 1 : vector<16x255xf32>, vector<16x1xf32> -> vector<16x256xf32>
    %61 = tpu.iota {dimensions = array<i32: 1>} : vector<16x256xi32>
    %c128_i32_22 = arith.constant 128 : i32
    %c0_i32_23 = arith.constant 0 : i32
    %62 = arith.cmpi eq, %c128_i32_22, %c0_i32_23 : i32
    %c1_i32_24 = arith.constant 1 : i32
    %63 = arith.select %62, %c1_i32_24, %c128_i32_22 : i32
    %64 = vector.broadcast %63 : i32 to vector<16x256xi32>
    %65 = arith.remsi %61, %64 : vector<16x256xi32>
    %c0_i32_25 = arith.constant 0 : i32
    %66 = vector.broadcast %c0_i32_25 : i32 to vector<16x256xi32>
    %67 = arith.cmpi ne, %65, %66 : vector<16x256xi32>
    %c0_i32_26 = arith.constant 0 : i32
    %68 = vector.broadcast %c0_i32_26 : i32 to vector<16x256xi32>
    %69 = arith.cmpi slt, %65, %68 : vector<16x256xi32>
    %c0_i32_27 = arith.constant 0 : i32
    %70 = arith.cmpi slt, %63, %c0_i32_27 : i32
    %71 = vector.broadcast %70 : i1 to vector<16x256xi1>
    %72 = vector.broadcast %71 : vector<16x256xi1> to vector<16x256xi1>
    %73 = arith.xori %69, %72 : vector<16x256xi1>
    %74 = arith.andi %73, %67 : vector<16x256xi1>
    %75 = vector.broadcast %63 : i32 to vector<16x256xi32>
    %76 = arith.addi %65, %75 : vector<16x256xi32>
    %77 = arith.select %74, %76, %65 : vector<16x256xi1>, vector<16x256xi32>
    %c1_i32_28 = arith.constant 1 : i32
    %78 = vector.broadcast %c1_i32_28 : i32 to vector<16x256xi32>
    %79 = arith.addi %77, %78 : vector<16x256xi32>
    %c0_i32_29 = arith.constant 0 : i32
    %80 = vector.broadcast %c0_i32_29 : i32 to vector<16x256xi32>
    %81 = arith.cmpi sge, %79, %80 : vector<16x256xi32>
    %c1_i32_30 = arith.constant 1 : i32
    %82 = vector.broadcast %c1_i32_30 : i32 to vector<16x256xi32>
    %83 = arith.addi %77, %82 : vector<16x256xi32>
    %c128_i32_31 = arith.constant 128 : i32
    %84 = vector.broadcast %c128_i32_31 : i32 to vector<16x256xi32>
    %85 = arith.cmpi slt, %83, %84 : vector<16x256xi32>
    %86 = arith.andi %81, %85 : vector<16x256xi1>
    %cst_32 = arith.constant 0.000000e+00 : f32
    %87 = vector.broadcast %cst_32 : f32 to vector<16x256xf32>
    %88 = arith.select %86, %60, %87 : vector<16x256xi1>, vector<16x256xf32>
    %89 = tpu.concatenate %57, %25, %88 in 0 : vector<16x256xf32>, vector<16x256xf32>, vector<16x256xf32> -> vector<48x256xf32>
    %90 = arith.truncf %89 : vector<48x256xf32> to vector<48x256xbf16>
    %cst_33 = arith.constant dense<0.000000e+00> : vector<8x256xf32>
    %91 = tpu.matmul %26, %90, %cst_33 {dimension_numbers = #tpu.dot_dimension_numbers<[1], [0], [0], [1], [0, 0, 1, 1], [], []>} : vector<8x48xbf16>, vector<48x256xbf16>, vector<8x256xf32> -> vector<8x256xf32>
    %c0_34 = arith.constant 0 : index
    %c0_35 = arith.constant 0 : index
    %92 = vector.load %arg6[%c0_34, %c0_35] : memref<8x1xf32, #tpu.memory_space<vmem>>, vector<8x1xf32>
    %c0_36 = arith.constant 0 : index
    %c0_37 = arith.constant 0 : index
    %93 = vector.load %arg7[%c0_36, %c0_37] : memref<8x1xf32, #tpu.memory_space<vmem>>, vector<8x1xf32>
    %cst_38 = arith.constant dense<0.000000e+00> : vector<8xf32>
    %94 = vector.multi_reduction <add>, %91, %cst_38 [1] : vector<8x256xf32> to vector<8xf32>
    %95 = vector.shape_cast %94 : vector<8xf32> to vector<8x1xf32>
    %96 = arith.mulf %91, %91 : vector<8x256xf32>
    %cst_39 = arith.constant dense<0.000000e+00> : vector<8xf32>
    %97 = vector.multi_reduction <add>, %96, %cst_39 [1] : vector<8x256xf32> to vector<8xf32>
    %98 = vector.shape_cast %97 : vector<8xf32> to vector<8x1xf32>
    %cst_40 = arith.constant 3.906250e-03 : f32
    %99 = vector.broadcast %cst_40 : f32 to vector<8x1xf32>
    %100 = arith.mulf %95, %99 : vector<8x1xf32>
    %cst_41 = arith.constant 3.906250e-03 : f32
    %101 = vector.broadcast %cst_41 : f32 to vector<8x1xf32>
    %102 = arith.mulf %98, %101 : vector<8x1xf32>
    %103 = arith.mulf %100, %100 : vector<8x1xf32>
    %104 = arith.subf %102, %103 : vector<8x1xf32>
    %cst_42 = arith.constant 9.99999974E-6 : f32
    %105 = vector.broadcast %cst_42 : f32 to vector<8x1xf32>
    %106 = arith.addf %104, %105 : vector<8x1xf32>
    %107 = math.rsqrt %106 : vector<8x1xf32>
    %108 = arith.mulf %107, %92 : vector<8x1xf32>
    %109 = vector.broadcast %100 : vector<8x1xf32> to vector<8x256xf32>
    %110 = arith.subf %91, %109 : vector<8x256xf32>
    %111 = vector.broadcast %108 : vector<8x1xf32> to vector<8x256xf32>
    %112 = arith.mulf %110, %111 : vector<8x256xf32>
    %113 = vector.broadcast %93 : vector<8x1xf32> to vector<8x256xf32>
    %114 = arith.addf %112, %113 : vector<8x256xf32>
    %cst_43 = arith.constant 0.000000e+00 : f32
    %115 = vector.broadcast %cst_43 : f32 to vector<8x256xf32>
    %116 = arith.maximumf %114, %115 : vector<8x256xf32>
    %c0_44 = arith.constant 0 : index
    %c0_45 = arith.constant 0 : index
    %117 = vector.load %arg5[%c0_44, %c0_45] : memref<8x24xbf16, #tpu.memory_space<vmem>>, vector<8x24xbf16>
    %cst_46 = arith.constant 0.000000e+00 : f32
    %118 = vector.broadcast %cst_46 : f32 to vector<8x1xf32>
    %119 = vector.extract_strided_slice %116 {offsets = [0, 0], sizes = [8, 255], strides = [1, 1]} : vector<8x256xf32> to vector<8x255xf32>
    %120 = tpu.concatenate %118, %119 in 1 : vector<8x1xf32>, vector<8x255xf32> -> vector<8x256xf32>
    %121 = tpu.iota {dimensions = array<i32: 1>} : vector<8x256xi32>
    %c128_i32_47 = arith.constant 128 : i32
    %c0_i32_48 = arith.constant 0 : i32
    %122 = arith.cmpi eq, %c128_i32_47, %c0_i32_48 : i32
    %c1_i32_49 = arith.constant 1 : i32
    %123 = arith.select %122, %c1_i32_49, %c128_i32_47 : i32
    %124 = vector.broadcast %123 : i32 to vector<8x256xi32>
    %125 = arith.remsi %121, %124 : vector<8x256xi32>
    %c0_i32_50 = arith.constant 0 : i32
    %126 = vector.broadcast %c0_i32_50 : i32 to vector<8x256xi32>
    %127 = arith.cmpi ne, %125, %126 : vector<8x256xi32>
    %c0_i32_51 = arith.constant 0 : i32
    %128 = vector.broadcast %c0_i32_51 : i32 to vector<8x256xi32>
    %129 = arith.cmpi slt, %125, %128 : vector<8x256xi32>
    %c0_i32_52 = arith.constant 0 : i32
    %130 = arith.cmpi slt, %123, %c0_i32_52 : i32
    %131 = vector.broadcast %130 : i1 to vector<8x256xi1>
    %132 = vector.broadcast %131 : vector<8x256xi1> to vector<8x256xi1>
    %133 = arith.xori %129, %132 : vector<8x256xi1>
    %134 = arith.andi %133, %127 : vector<8x256xi1>
    %135 = vector.broadcast %123 : i32 to vector<8x256xi32>
    %136 = arith.addi %125, %135 : vector<8x256xi32>
    %137 = arith.select %134, %136, %125 : vector<8x256xi1>, vector<8x256xi32>
    %c-1_i32_53 = arith.constant -1 : i32
    %138 = vector.broadcast %c-1_i32_53 : i32 to vector<8x256xi32>
    %139 = arith.addi %137, %138 : vector<8x256xi32>
    %c0_i32_54 = arith.constant 0 : i32
    %140 = vector.broadcast %c0_i32_54 : i32 to vector<8x256xi32>
    %141 = arith.cmpi sge, %139, %140 : vector<8x256xi32>
    %c-1_i32_55 = arith.constant -1 : i32
    %142 = vector.broadcast %c-1_i32_55 : i32 to vector<8x256xi32>
    %143 = arith.addi %137, %142 : vector<8x256xi32>
    %c128_i32_56 = arith.constant 128 : i32
    %144 = vector.broadcast %c128_i32_56 : i32 to vector<8x256xi32>
    %145 = arith.cmpi slt, %143, %144 : vector<8x256xi32>
    %146 = arith.andi %141, %145 : vector<8x256xi1>
    %cst_57 = arith.constant 0.000000e+00 : f32
    %147 = vector.broadcast %cst_57 : f32 to vector<8x256xf32>
    %148 = arith.select %146, %120, %147 : vector<8x256xi1>, vector<8x256xf32>
    %149 = vector.extract_strided_slice %116 {offsets = [0, 1], sizes = [8, 255], strides = [1, 1]} : vector<8x256xf32> to vector<8x255xf32>
    %cst_58 = arith.constant 0.000000e+00 : f32
    %150 = vector.broadcast %cst_58 : f32 to vector<8x1xf32>
    %151 = tpu.concatenate %149, %150 in 1 : vector<8x255xf32>, vector<8x1xf32> -> vector<8x256xf32>
    %152 = tpu.iota {dimensions = array<i32: 1>} : vector<8x256xi32>
    %c128_i32_59 = arith.constant 128 : i32
    %c0_i32_60 = arith.constant 0 : i32
    %153 = arith.cmpi eq, %c128_i32_59, %c0_i32_60 : i32
    %c1_i32_61 = arith.constant 1 : i32
    %154 = arith.select %153, %c1_i32_61, %c128_i32_59 : i32
    %155 = vector.broadcast %154 : i32 to vector<8x256xi32>
    %156 = arith.remsi %152, %155 : vector<8x256xi32>
    %c0_i32_62 = arith.constant 0 : i32
    %157 = vector.broadcast %c0_i32_62 : i32 to vector<8x256xi32>
    %158 = arith.cmpi ne, %156, %157 : vector<8x256xi32>
    %c0_i32_63 = arith.constant 0 : i32
    %159 = vector.broadcast %c0_i32_63 : i32 to vector<8x256xi32>
    %160 = arith.cmpi slt, %156, %159 : vector<8x256xi32>
    %c0_i32_64 = arith.constant 0 : i32
    %161 = arith.cmpi slt, %154, %c0_i32_64 : i32
    %162 = vector.broadcast %161 : i1 to vector<8x256xi1>
    %163 = vector.broadcast %162 : vector<8x256xi1> to vector<8x256xi1>
    %164 = arith.xori %160, %163 : vector<8x256xi1>
    %165 = arith.andi %164, %158 : vector<8x256xi1>
    %166 = vector.broadcast %154 : i32 to vector<8x256xi32>
    %167 = arith.addi %156, %166 : vector<8x256xi32>
    %168 = arith.select %165, %167, %156 : vector<8x256xi1>, vector<8x256xi32>
    %c1_i32_65 = arith.constant 1 : i32
    %169 = vector.broadcast %c1_i32_65 : i32 to vector<8x256xi32>
    %170 = arith.addi %168, %169 : vector<8x256xi32>
    %c0_i32_66 = arith.constant 0 : i32
    %171 = vector.broadcast %c0_i32_66 : i32 to vector<8x256xi32>
    %172 = arith.cmpi sge, %170, %171 : vector<8x256xi32>
    %c1_i32_67 = arith.constant 1 : i32
    %173 = vector.broadcast %c1_i32_67 : i32 to vector<8x256xi32>
    %174 = arith.addi %168, %173 : vector<8x256xi32>
    %c128_i32_68 = arith.constant 128 : i32
    %175 = vector.broadcast %c128_i32_68 : i32 to vector<8x256xi32>
    %176 = arith.cmpi slt, %174, %175 : vector<8x256xi32>
    %177 = arith.andi %172, %176 : vector<8x256xi1>
    %cst_69 = arith.constant 0.000000e+00 : f32
    %178 = vector.broadcast %cst_69 : f32 to vector<8x256xf32>
    %179 = arith.select %177, %151, %178 : vector<8x256xi1>, vector<8x256xf32>
    %180 = tpu.concatenate %148, %116, %179 in 0 : vector<8x256xf32>, vector<8x256xf32>, vector<8x256xf32> -> vector<24x256xf32>
    %181 = arith.truncf %180 : vector<24x256xf32> to vector<24x256xbf16>
    %cst_70 = arith.constant dense<0.000000e+00> : vector<8x256xf32>
    %182 = tpu.matmul %117, %181, %cst_70 {dimension_numbers = #tpu.dot_dimension_numbers<[1], [0], [0], [1], [0, 0, 1, 1], [], []>} : vector<8x24xbf16>, vector<24x256xbf16>, vector<8x256xf32> -> vector<8x256xf32>
    %c0_71 = arith.constant 0 : index
    %c0_72 = arith.constant 0 : index
    %183 = vector.load %arg6[%c0_71, %c0_72] : memref<8x1xf32, #tpu.memory_space<vmem>>, vector<8x1xf32>
    %c0_73 = arith.constant 0 : index
    %c0_74 = arith.constant 0 : index
    %184 = vector.load %arg7[%c0_73, %c0_74] : memref<8x1xf32, #tpu.memory_space<vmem>>, vector<8x1xf32>
    %cst_75 = arith.constant dense<0.000000e+00> : vector<8xf32>
    %185 = vector.multi_reduction <add>, %182, %cst_75 [1] : vector<8x256xf32> to vector<8xf32>
    %186 = vector.shape_cast %185 : vector<8xf32> to vector<8x1xf32>
    %187 = arith.mulf %182, %182 : vector<8x256xf32>
    %cst_76 = arith.constant dense<0.000000e+00> : vector<8xf32>
    %188 = vector.multi_reduction <add>, %187, %cst_76 [1] : vector<8x256xf32> to vector<8xf32>
    %189 = vector.shape_cast %188 : vector<8xf32> to vector<8x1xf32>
    %cst_77 = arith.constant 3.906250e-03 : f32
    %190 = vector.broadcast %cst_77 : f32 to vector<8x1xf32>
    %191 = arith.mulf %186, %190 : vector<8x1xf32>
    %cst_78 = arith.constant 3.906250e-03 : f32
    %192 = vector.broadcast %cst_78 : f32 to vector<8x1xf32>
    %193 = arith.mulf %189, %192 : vector<8x1xf32>
    %194 = arith.mulf %191, %191 : vector<8x1xf32>
    %195 = arith.subf %193, %194 : vector<8x1xf32>
    %cst_79 = arith.constant 9.99999974E-6 : f32
    %196 = vector.broadcast %cst_79 : f32 to vector<8x1xf32>
    %197 = arith.addf %195, %196 : vector<8x1xf32>
    %198 = math.rsqrt %197 : vector<8x1xf32>
    %199 = arith.mulf %198, %183 : vector<8x1xf32>
    %200 = vector.broadcast %191 : vector<8x1xf32> to vector<8x256xf32>
    %201 = arith.subf %182, %200 : vector<8x256xf32>
    %202 = vector.broadcast %199 : vector<8x1xf32> to vector<8x256xf32>
    %203 = arith.mulf %201, %202 : vector<8x256xf32>
    %204 = vector.broadcast %184 : vector<8x1xf32> to vector<8x256xf32>
    %205 = arith.addf %203, %204 : vector<8x256xf32>
    %cst_80 = arith.constant 0.000000e+00 : f32
    %206 = vector.broadcast %cst_80 : f32 to vector<8x256xf32>
    %207 = arith.maximumf %205, %206 : vector<8x256xf32>
    %c0_81 = arith.constant 0 : index
    %c0_82 = arith.constant 0 : index
    %208 = vector.load %arg8[%c0_81, %c0_82] : memref<8x256xf32, #tpu.memory_space<vmem>>, vector<8x256xf32>
    tpu.vector_store %arg8[%c0_81, %c0_82], %207 {strides = array<i32>} : memref<8x256xf32, #tpu.memory_space<vmem>>, vector<8x256xf32>,
    return
  }
}

</mosaic_0001>

<bundles_post_ra>
// kernel: tpu_custom_call.1
= control target key start
LH: loop header
LB: loop body
LE: loop exit
PB: predicated region body
PF: predicated region fallthrough
CT: control target
= control target key end

     0   :  { %s637_s0 = inlined_call_operand.vmem [shape: f32[8,256], index: 0, kind: input, shape index: {}]   ;;  %s638_s1 = inlined_call_operand.vmem [shape: f32[8,256], index: 1, kind: input, shape index: {}]   ;;  %s639_s2 = inlined_call_operand.vmem [shape: f32[16,1], index: 2, kind: input, shape index: {}]   ;;  %s640_s3 = inlined_call_operand.vmem [shape: f32[16,1], index: 3, kind: input, shape index: {}]   ;;  %s641_s4 = inlined_call_operand.vmem [shape: bf16[8,48], index: 4, kind: input, shape index: {}]   ;;  %s642_s5 = inlined_call_operand.vmem [shape: bf16[8,24], index: 5, kind: input, shape index: {}]   ;;  %s643_s6 = inlined_call_operand.vmem [shape: f32[8,1], index: 6, kind: input, shape index: {}]   ;;  %s644_s7 = inlined_call_operand.vmem [shape: f32[8,1], index: 7, kind: input, shape index: {}]   ;;  %s645_s8 = inlined_call_operand.hbm [shape: f32[8,256], index: 8, kind: output, shape index: {}]  }
   0x1   :  { %v31_v0 = vld [vmem:[%s637_s0] sm:$0xff]  ;;  %v32_v1 = vld [vmem:[%s637_s0 + $0x8] sm:$0xff] }
   0x2   :  { %v33_v2 = vld [vmem:[%s638_s1] sm:$0xff]  ;;  %v39_v3 = vadd.f32 %v32_v1, %v31_v0  ;;  %v45_v4 = vmul.f32 %v31_v0, %v31_v0  ;;  %v46_v5 = vmul.f32 %v32_v1, %v32_v1  ;;  %v34_v6 = vld [vmem:[%s638_s1 + $0x8] sm:$0xff] }
   0x3   :  { %v47_v7 = vmul.f32 %v33_v2, %v33_v2 }
   0x4   :  { %13 = vsyncpa [#allocation3], 0  ;;  %v48_v8 = vmul.f32 %v34_v6, %v34_v6  ;;  %40 = vadd.xlane.f32.xlu0 %v39_v3  ;;  %v49_v9 = vadd.f32 %v46_v5, %v45_v4  ;;  %v42_v10 = vadd.f32 %v34_v6, %v33_v2  ;;  %v37_v12 = vld [vmem:[%s640_s3] sm:$0xff]  ;;  %v488_v13 = vmov 0   ;;  %v36_v31 = vld [vmem:[%s639_s2 + $0x8] sm:$0xff] }
   0x5   :  { %427 = vset.pattern.permute.xlu1 %v488_v13  ;;  %426 = vset.pattern.permute.xlu0 %v488_v13  ;;  %v35_v28 = vld [vmem:[%s639_s2] sm:$0xff]  ;;  %v38_v34 = vld [vmem:[%s640_s3 + $0x8] sm:$0xff]  ;;  %s489_s2 = smov 127   ;;  %s490_s3 = smov 1   ;;  %v123_v57 = vlaneseq  ;;  %vm170_vm0 = vcmask 1039360   ;;  %vm114_vm5 = vcmask 7168  }
   0x6   :  { %50 = vadd.xlane.f32.xlu1 %v49_v9  ;;  %v52_v11 = vadd.f32 %v48_v8, %v47_v7  ;;  %233 = vmatprep.mubr.bf16.mxu0 %v488_v13  ;;  %vm197_vm10 = vcmask 392192   ;;  %vm308_vm11 = vcmask 1043456   ;;  %vm491_vm12 = vmmov 1  }
   0x7   :  { %347 = vmatprep.mubr.bf16.mxu1 %v488_v13  ;;  %v124_v58 = vand.u32 127, %v123_v57  ;;  %vm304_vm15 = vcmask 195584  }
   0x8   :  { %43 = vadd.xlane.f32.xlu0 %v42_v10 }
   0x9   :  { %v125_v59 = vadd.s32 128, %v124_v58  ;;  %v569_v63 = vadd.s32 1, %v124_v58  ;;  %v584_v13 = vadd.s32 4294967295, %v124_v58 }
   0xa   :  { %53 = vadd.xlane.f32.xlu1 %v52_v11 }
   0xb   :  { %v137_v60 = vand.u32 127, %v125_v59  ;;  %vm183_vm3 = vcmp.lt.s32.totalorder %v569_v63, 128  ;;  %vm152_vm7 = vcmp.ge.s32.totalorder %v584_v13, 0  ;;  %v277_v63 = vld [vmem:[%s642_s5] sm:$0xf]  ;;  %s492_s5 = smov [#allocation2]  }
   0xc   :  { %vm403_vm4 = vmpackc.low %vm183_vm3, %vm183_vm3  ;;  %s392_s24 = sshll.u32 %s492_s5, 4  ;;  %s393_s24 = int_to_ptr.vmem [resolvable:$true] %s392_s24 }
   0xd   :  { %v566_v61 = vadd.s32 1, %v137_v60  ;;  %vm409_vm9 = vmpackc.low %vm152_vm7, %vm152_vm7  ;;  %s466_s25 = scalar_lea.vmem %s393_s24, 256  ;;  %p471_p1 = scmp.lt.s32.totalorder %s393_s24, %s393_s24 }
   0xe   :  { %vm417_vm14 = vmpackc.low %vm491_vm12, %vm152_vm7  ;;  %p467_p0 = scmp.ne.s32.totalorder %s393_s24, %s466_s25  ;;  %p472_p2 = scmp.lt.s32.totalorder %s466_s25, %s466_s25 }
   0xf   :  { %vm184_vm1 = vcmp.lt.s32.totalorder %v566_v61, 128 }
  0x10   :  { %vm400_vm2 = vmpackc.low %vm184_vm1, %vm184_vm1  ;;  %p473_p3 = por %p472_p2, %p471_p1 }
  0x12   :  { %p474_p4 = pnand %p473_p3, %p467_p0 }
  0x1b   :  { %89 = vperm.xlu1 %427, %v37_v12   ;;  %v582_v12 = vadd.s32 4294967295, %v137_v60 }
  0x1d   :  { %vm153_vm6 = vcmp.ge.s32.totalorder %v582_v12, 0 }
  0x1e   :  { %vm406_vm8 = vmpackc.low %vm153_vm6, %vm153_vm6 }
  0x1f   :  { %vm414_vm13 = vmpackc.low %vm491_vm12, %vm153_vm6 }
  0x8d   :  { %v41_v14 = vpop.xlane.xlu0 %40 }
  0x8e   :  { %v55_v15 = vmul.f32 0.00390625, %v41_v14 }
  0x8f   :  { %v51_v16 = vpop.xlane.xlu1 %50 }
  0x90   :  { %v57_v17 = vmul.f32 0.00390625, %v51_v16  ;;  %v59_v18 = vmul.f32 %v55_v15, %v55_v15  ;;  %v69_v37 = vsub.f32 %v31_v0, %v55_v15  ;;  %v70_v38 = vsub.f32 %v32_v1, %v55_v15 }
  0x91   :  { %v44_v19 = vpop.xlane.xlu0 %43 }
  0x92   :  { %v61_v20 = vsub.f32 %v57_v17, %v59_v18  ;;  %v56_v21 = vmul.f32 0.00390625, %v44_v19 }
  0x93   :  { %v54_v22 = vpop.xlane.xlu1 %53 }
  0x94   :  { %v63_v23 = vadd.f32 1e-05, %v61_v20  ;;  %v58_v24 = vmul.f32 0.00390625, %v54_v22  ;;  %v60_v25 = vmul.f32 %v56_v21, %v56_v21  ;;  %v71_v42 = vsub.f32 %v33_v2, %v56_v21 }
  0x95   :  { %v72_v43 = vsub.f32 %v34_v6, %v56_v21 }
  0x96   :  { %458 = vrsqrt.f32 %v63_v23  ;;  %v62_v26 = vsub.f32 %v58_v24, %v60_v25  ;;  %v101_v25 = vld [vmem:[%s641_s4] sm:$0xf] }
  0x97   :  { %v90_v35 = vpop.permute.xlu1 %89 }
  0x98   :  { %v64_v27 = vadd.f32 1e-05, %v62_v26 }
  0x9a   :  { %460 = vrsqrt.f32 %v64_v27 }
  0xa3   :  { %v459_v29 = vpop.eup %458 }
  0xa4   :  { %v67_v30 = vmul.f32 %v459_v29, %v35_v28 }
  0xa6   :  { %75 = vperm.xlu0 %426, %v67_v30  }
  0xa7   :  { %v461_v32 = vpop.eup %460 }
  0xa8   :  { %v68_v33 = vmul.f32 %v461_v32, %v36_v31 }
  0xaa   :  { %80 = vperm.xlu1 %427, %v68_v33  }
  0xae   :  { %94 = vperm.xlu1 %427, %v38_v34   ;;  %v243_v34 = vld [vmem:[%s644_s7] sm:$0xff] }
 0x121   :  { %v76_v36 = vpop.permute.xlu0 %75 }
 0x122   :  { %v83_v40 = vmul.f32 %v76_v36, %v69_v37  ;;  %v84_v41 = vmul.f32 %v76_v36, %v70_v38 }
 0x124   :  { %v97_v47 = vadd.f32 %v90_v35, %v83_v40  ;;  %v98_v48 = vadd.f32 %v90_v35, %v84_v41 }
 0x125   :  { %v81_v39 = vpop.permute.xlu1 %80 }
 0x126   :  { %v85_v44 = vmul.f32 %v81_v39, %v71_v42  ;;  %v86_v45 = vmul.f32 %v81_v39, %v72_v43  ;;  %v438_v55 = vpack.i.bf16 %v98_v48, %v97_v47  ;;  %v607_v42 = vld [vmem:[%s643_s6] sm:$0xff] }
 0x129   :  { %v95_v46 = vpop.permute.xlu1 %94 }
 0x12a   :  { %v99_v49 = vadd.f32 %v95_v46, %v85_v44  ;;  %v100_v50 = vadd.f32 %v95_v46, %v86_v45 }
 0x12c   :  { %v428_v51 = vpack.i.bf16 %v100_v50, %v98_v48  ;;  %v433_v52 = vpack.i.bf16 %v99_v49, %v97_v47  ;;  %v194_v53 = vpack.c.bf16 %v100_v50, %v98_v48  ;;  %v193_v54 = vpack.c.bf16 %v99_v49, %v97_v47 }
 0x12d   :  { %v443_v56 = vpack.i.bf16 %v100_v50, %v99_v49 }
 0x12e   :  { %429 = vrot.lane.b32.xlu1 %v428_v51, %s489_s2 }
 0x132   :  { %434 = vrot.lane.b32.xlu1 %v433_v52, %s489_s2 }
 0x136   :  { %439 = vrot.lane.b32.xlu1 %v438_v55, %s490_s3 }
 0x13a   :  { %444 = vrot.lane.b32.xlu1 %v443_v56, %s490_s3 }
 0x1a0   :  { %v430_v62 = vpop.permute.xlu1 %429 }
 0x1a1   :  { %v432_v0 = vunpack.i.h.bf16 %v430_v62  ;;  %v431_v1 = vunpack.i.l.bf16 %v430_v62 }
 0x1a3   :  { %v177_v2 = vsel %vm170_vm0, %v431_v1, 0.0  ;;  %v178_v3 = vsel %vm170_vm0, %v432_v0, 0.0 }
 0x1a4   :  { %v435_v4 = vpop.permute.xlu1 %434  ;;  %v401_v5 = vpack.c.bf16 %v178_v3, %v177_v2 }
 0x1a5   :  { %v437_v6 = vunpack.i.h.bf16 %v435_v4  ;;  %v436_v7 = vunpack.i.l.bf16 %v435_v4 }
 0x1a6   :  { %402 = vmatprep.subr.msk.bf16.mxu0 %vm400_vm2, %v401_v5 }
 0x1a7   :  { %v171_v8 = vsel %vm170_vm0, %v436_v7, %v431_v1  ;;  %v172_v9 = vsel %vm170_vm0, %v437_v6, %v432_v0 }
 0x1a8   :  { %v440_v10 = vpop.permute.xlu1 %439  ;;  %v404_v11 = vpack.c.bf16 %v172_v9, %v171_v8 }
 0x1a9   :  { %v442_v14 = vunpack.i.h.bf16 %v440_v10  ;;  %v441_v15 = vunpack.i.l.bf16 %v440_v10 }
 0x1aa   :  { %405 = vmatpush1.bf16.msk.msra.mxu0 %vm403_vm4, %v404_v11 }
 0x1ab   :  { %213 = vmatprep.subr.bf16.mxu0 %v194_v53  ;;  %v115_v19 = vsel %vm114_vm5, %v441_v15, %v442_v14  ;;  %v121_v20 = vsel %vm114_vm5, 0.0, %v441_v15 }
 0x1ac   :  { %v445_v16 = vpop.permute.xlu1 %444 }
 0x1ad   :  { %v447_v17 = vunpack.i.h.bf16 %v445_v16  ;;  %v446_v18 = vunpack.i.l.bf16 %v445_v16 }
 0x1ae   :  { %214 = vmatpush1.bf16.msra.mxu0 %v193_v54 }
 0x1af   :  { %v116_v21 = vsel %vm114_vm5, %v446_v18, %v447_v17  ;;  %v122_v22 = vsel %vm114_vm5, 0.0, %v446_v18 }
 0x1b0   :  { %v407_v23 = vpack.c.bf16 %v116_v21, %v115_v19  ;;  %v410_v24 = vpack.c.bf16 %v122_v22, %v121_v20 }
 0x1b2   :  { %408 = vmatprep.subr.msk.bf16.mxu0 %vm406_vm8, %v407_v23 }
 0x1b3   :  { %411 = vmatpush1.bf16.msk.msra.mxu0 %vm409_vm9, %v410_v24 }
 0x1b6   :  { %412 = vmatmul.mubr.msk.bf16.vlgmr.msra.gmra.mxu0 %vm197_vm10, %v101_v25 }
 0x276   :  { %v235_v26 = vpop.f32.mrf.mxu0 }
 0x277   :  { %v247_v29 = vmul.f32 %v235_v26, %v235_v26 }
 0x278   :  { %v237_v27 = vpop.f32.mrf.mxu0 }
 0x279   :  { %v244_v28 = vadd.f32 %v237_v27, %v235_v26  ;;  %v248_v30 = vmul.f32 %v237_v27, %v237_v27 }
 0x27a   :  { %v239_v31 = vpop.f32.mrf.mxu0 }
 0x27b   :  { %245 = vadd.xlane.f32.xlu1 %v244_v28  ;;  %v249_v32 = vadd.f32 %v248_v30, %v247_v29 }
 0x27c   :  { %v240_v33 = vpop.f32.mrf.mxu0 }
 0x27d   :  { %250 = vadd.xlane.f32.xlu0 %v249_v32 }
 0x28c   :  { %270 = vperm.xlu1 %427, %v243_v34  }
 0x304   :  { %v246_v35 = vpop.xlane.xlu1 %245 }
 0x305   :  { %v252_v36 = vmul.f32 0.00390625, %v246_v35 }
 0x306   :  { %v251_v37 = vpop.xlane.xlu0 %250 }
 0x307   :  { %v253_v38 = vmul.f32 0.00390625, %v251_v37  ;;  %v254_v39 = vmul.f32 %v252_v36, %v252_v36  ;;  %v259_v45 = vsub.f32 %v235_v26, %v252_v36  ;;  %v260_v46 = vsub.f32 %v237_v27, %v252_v36 }
 0x308   :  { %v610_v50 = vpop.permute.xlu1 %270 }
 0x309   :  { %v255_v40 = vsub.f32 %v253_v38, %v254_v39 }
 0x30b   :  { %v256_v41 = vadd.f32 1e-05, %v255_v40 }
 0x30d   :  { %462 = vrsqrt.f32 %v256_v41 }
 0x31a   :  { %v463_v43 = vpop.eup %462 }
 0x31b   :  { %v258_v44 = vmul.f32 %v463_v43, %v607_v42 }
 0x31d   :  { %263 = vperm.xlu0 %426, %v258_v44  }
 0x398   :  { %v264_v47 = vpop.permute.xlu0 %263 }
 0x399   :  { %v266_v48 = vmul.f32 %v264_v47, %v259_v45  ;;  %v267_v49 = vmul.f32 %v264_v47, %v260_v46 }
 0x39b   :  { %v273_v51 = vadd.f32 %v610_v50, %v266_v48  ;;  %v274_v52 = vadd.f32 %v610_v50, %v267_v49 }
 0x39d   :  { %v275_v53 = vmax.f32 %v273_v51, 0.0  ;;  %v276_v54 = vmax.f32 %v274_v52, 0.0 }
 0x39f   :  { %v453_v55 = vpack.i.bf16 %v276_v54, %v275_v53 }
 0x3a1   :  { %454 = vrot.lane.b32.xlu0 %v453_v55, %s490_s3  ;;  %449 = vrot.lane.b32.xlu1 %v453_v55, %s489_s2 }
 0x413   :  { %v455_v56 = vpop.permute.xlu0 %454  ;;  %v450_v57 = vpop.permute.xlu1 %449 }
 0x414   :  { %v457_v58 = vunpack.i.h.bf16 %v455_v56  ;;  %v456_v59 = vunpack.i.l.bf16 %v455_v56  ;;  %v452_v60 = vunpack.i.h.bf16 %v450_v57  ;;  %v451_v62 = vunpack.i.l.bf16 %v450_v57 }
 0x416   :  { %v297_v0 = vsel %vm170_vm0, %v452_v60, 0.0  ;;  %v294_v1 = vsel %vm170_vm0, %v451_v62, %v452_v60  ;;  %v284_v2 = vsel %vm114_vm5, %v456_v59, %v457_v58  ;;  %v287_v7 = vsel %vm114_vm5, 0.0, %v456_v59 }
 0x417   :  { %v299_v3 = vsel %vm184_vm1, %v297_v0, 0.0  ;;  %v298_v4 = vsel %vm183_vm3, %v294_v1, 0.0  ;;  %v415_v8 = vpack.c.bf16 %v276_v54, %v284_v2  ;;  %v418_v61 = vpack.c.bf16 %v275_v53, %v287_v7 }
 0x418   :  { %v303_v5 = vpack.c.bf16 %v299_v3, %v299_v3  ;;  %v302_v6 = vpack.c.bf16 %v298_v4, %v298_v4 }
 0x41a   :  { %413 = vmatprep.subr.msk.bf16.mxu1 %vm308_vm11, %v303_v5  ;;  %v310_v9 = vsel %vm308_vm11, %v302_v6, 0 }
 0x41b   :  { %328 = vmatpush1.bf16.msra.mxu1 %v310_v9 }
 0x41c   :  { %416 = vmatprep.subr.msk.bf16.mxu1 %vm414_vm13, %v415_v8 }
 0x41f   :  { %419 = vmatpush1.bf16.msk.msra.mxu1 %vm417_vm14, %v418_v61 }
 0x422   :  { %420 = vmatmul.mubr.msk.bf16.vlgmr.msra.gmra.mxu1 %vm304_vm15, %v277_v63 }
 0x4e2   :  { %v349_v10 = vpop.f32.mrf.mxu1 }
 0x4e3   :  { %v359_v14 = vmul.f32 %v349_v10, %v349_v10 }
 0x4e4   :  { %v351_v11 = vpop.f32.mrf.mxu1 }
 0x4e5   :  { %v356_v12 = vadd.f32 %v351_v11, %v349_v10  ;;  %v360_v15 = vmul.f32 %v351_v11, %v351_v11 }
 0x4e6   :  { %v353_v16 = vpop.f32.mrf.mxu1 }
 0x4e7   :  { %357 = vadd.xlane.f32.xlu1 %v356_v12  ;;  %v361_v17 = vadd.f32 %v360_v15, %v359_v14 }
 0x4e8   :  { %v354_v18 = vpop.f32.mrf.mxu1 }
 0x4e9   :  { %362 = vadd.xlane.f32.xlu0 %v361_v17 }
 0x570   :  { %v358_v13 = vpop.xlane.xlu1 %357 }
 0x571   :  { %v364_v19 = vmul.f32 0.00390625, %v358_v13 }
 0x572   :  { %v363_v20 = vpop.xlane.xlu0 %362 }
 0x573   :  { %v366_v21 = vmul.f32 %v364_v19, %v364_v19  ;;  %v365_v22 = vmul.f32 0.00390625, %v363_v20  ;;  %v371_v27 = vsub.f32 %v349_v10, %v364_v19  ;;  %v372_v28 = vsub.f32 %v351_v11, %v364_v19 }
 0x575   :  { %v367_v23 = vsub.f32 %v365_v22, %v366_v21 }
 0x577   :  { %v368_v24 = vadd.f32 1e-05, %v367_v23 }
 0x579   :  { %464 = vrsqrt.f32 %v368_v24 }
 0x586   :  { %v465_v25 = vpop.eup %464 }
 0x587   :  { %v370_v26 = vmul.f32 %v465_v25, %v607_v42 }
 0x589   :  { %375 = vperm.xlu0 %426, %v370_v26  }
 0x604   :  { %v376_v29 = vpop.permute.xlu0 %375 }
 0x605   :  { %v378_v30 = vmul.f32 %v376_v29, %v371_v27  ;;  %v379_v31 = vmul.f32 %v376_v29, %v372_v28 }
 0x607   :  { %v380_v32 = vadd.f32 %v378_v30, %v610_v50  ;;  %v381_v33 = vadd.f32 %v379_v31, %v610_v50 }
 0x609   :  { %v382_v34 = vmax.f32 %v380_v32, 0.0  ;;  %v383_v35 = vmax.f32 %v381_v33, 0.0 }
 0x60b   :  { %384 = vst [vmem:[#allocation2] sm:$0xff] %v382_v34  ;;  %385 = vst [vmem:[#allocation2 + $0x8] sm:$0xff] %v383_v35 }
 0x60c   :  { %477 = shalt.err (!%p474_p4)
}
 0x60d   :  { %395 = dma.vmem_to_hbm [thread:$0]  %s393_s24, 256, %s645_s8, [#allocation3]  }
 0x60e   :  { %486 = dma.done.wait [#allocation3], 256  }
 0x60f   :  { %487 = vsyncadd [#allocation3], 4294967040 }
 0x610   :  { %399 = vsyncpa [#allocation3], 1 }

</bundles_post_ra>
